<compile_context>
chip_gen: v6e
topology: v6e:2x2x1
jax: 0.10.0
libtpu: 0.0.40
codegen_flags: <defaults>
</compile_context>

<pallas_src>
from functools import partial

import numpy as np
import jax
import jax.numpy as jnp
from jax.experimental import pallas as pl
from jax.experimental.pallas import tpu as pltpu


def _round_up(n, m):
    return ((n + m - 1) // m) * m


def _cdiv(a, b):
    return (a + b - 1) // b


# ----------------------------------------------------------------------------
# Pallas kernel: MLP bottleneck + cosine similarity for one tile of patches.
#   x_ref : (D, TN)  patch columns (tail columns of the last tile may be
#                    garbage from the partial OOB read; masked below)
#   p_ref : packed params block
#             rows  0:4       [ W1^T (4,D)  | ... | b1 (4,1) in last col ]
#             rows  8:12      [ W2^T (4,4)  | ... | b2 (4,1) in last col ]
#             rows 16:16+D    [ W3^T (D,4)  | ... | b3 (D,1) in last col ]
#   o_ref : (1, TN)  lane-dense row of cosine similarities
# ----------------------------------------------------------------------------
def _mlp_cosine_kernel(x_ref, p_ref, o_ref, *, d, n_valid):
    x = x_ref[...]                                                   # (D, TN)

    bc = p_ref.shape[-1] - 1                                         # bias column
    w1t = p_ref[0:4, 0:d]                                            # (4, D)
    b1 = p_ref[0:4, bc:bc + 1]                                       # (4, 1)
    w2t = p_ref[8:12, 0:4]                                           # (4, 4)
    b2 = p_ref[8:12, bc:bc + 1]
    w3t = p_ref[16:16 + d, 0:4]                                      # (D, 4)
    b3 = p_ref[16:16 + d, bc:bc + 1]

    h = jnp.maximum(jnp.dot(w1t, x, preferred_element_type=jnp.float32) + b1, 0.0)
    h = jnp.maximum(jnp.dot(w2t, h, preferred_element_type=jnp.float32) + b2, 0.0)
    y = jnp.maximum(jnp.dot(w3t, h, preferred_element_type=jnp.float32) + b3, 0.0)

    dot = jnp.sum(x * y, axis=0, keepdims=True)                      # (1, TN)
    nxx = jnp.sum(x * x, axis=0, keepdims=True)
    nyy = jnp.sum(y * y, axis=0, keepdims=True)
    # cos = dot / max(||x||*||y||, 1e-8) == dot * rsqrt(max(nxx*nyy, 1e-16))
    cos = dot * jax.lax.rsqrt(jnp.maximum(nxx * nyy, 1e-16))

    # Mask tail lanes of the last (partial) tile deliberately -> 0.
    tn = o_ref.shape[-1]
    col = pl.program_id(0) * tn + jax.lax.broadcasted_iota(jnp.int32, (1, tn), 1)
    o_ref[...] = jnp.where(col < n_valid, cos, 0.0)


def _choose_tile(n, tile_n):
    """Lane tile (multiple of 128, floor 128) and number of grid steps."""
    n128 = _round_up(max(n, 1), 128)
    tn = min(_round_up(max(tile_n, 128), 128), n128)
    # Megacore (v7x): guarantee >=2 grid steps whenever there is enough work.
    if n128 >= 256 and tn >= n128:
        tn = _round_up(_cdiv(n128, 2), 128)
    num_tiles = _cdiv(n, tn)
    return tn, num_tiles


def mlp_cosine_pallas(patches_t, packed_params, *, tile_n=2048):
    """patches_t: (D, n) f32 patch columns. Returns (n,) cosine similarities."""
    d, n = patches_t.shape
    tn, num_tiles = _choose_tile(n, tile_n)
    npad = num_tiles * tn                    # lane-dense, unmasked output stores

    kern = partial(_mlp_cosine_kernel, d=d, n_valid=n)
    out = pl.pallas_call(
        kern,
        out_shape=jax.ShapeDtypeStruct((1, npad), jnp.float32),
        grid=(num_tiles,),
        in_specs=[
            pl.BlockSpec((d, tn), lambda i: (0, i)),
            # block == full array dims; constant index -> weights stay resident
            pl.BlockSpec(packed_params.shape, lambda i: (0, 0)),
        ],
        out_specs=pl.BlockSpec((1, tn), lambda i: (0, i)),
        compiler_params=pltpu.CompilerParams(
            dimension_semantics=("parallel",)),
    )(patches_t, packed_params)
    return out[0, :n]


# ----------------------------------------------------------------------------
# XLA glue.
# ----------------------------------------------------------------------------
def extract_patches_t(img, K, S):
    """img: (bs, ch, h, w) -> ((K*K, bs*ppr*ppr) f32, ppr).

    K*K static strided slices (no gather); row d = i*K + l, column
    p = b*ppr*ppr + pr*ppr + pc, matching the PyTorch loop order.
    """
    bs, _, h, _ = img.shape
    ppr = (h - K) // S + 1
    img0 = img[:, 0].astype(jnp.float32)                             # (bs, h, w)
    lim = (ppr - 1) * S + 1
    rows = []
    for i in range(K):
        for l in range(K):
            sl = img0[:, i:i + lim:S, l:l + lim:S]                   # (bs, ppr, ppr)
            rows.append(sl.reshape(1, bs * ppr * ppr))
    return jnp.concatenate(rows, axis=0), ppr


def fold_average(sims, bs, image_size, K, S, ppr):
    """sims: (bs*ppr*ppr,) -> averaged anomaly map (bs, image_size, image_size).

    Overlap-add via a transposed convolution (ones kernel, lhs_dilation=S);
    coverage count is static and precomputed with numpy.  Never-covered
    pixels give 0 * inf = NaN, same as torch's 0/0.
    """
    sims = sims.reshape(bs, 1, ppr, ppr)
    ones_k = jnp.ones((1, 1, K, K), jnp.float32)
    acc = jax.lax.conv_general_dilated(
        sims, ones_k,
        window_strides=(1, 1),
        padding=((K - 1, K - 1), (K - 1, K - 1)),
        lhs_dilation=(S, S),
        dimension_numbers=("NCHW", "OIHW", "NCHW"),
        precision=jax.lax.Precision.HIGHEST)[:, 0]                   # (bs, cov, cov)
    cov = (ppr - 1) * S + K
    if cov < image_size:
        acc = jnp.pad(acc, ((0, 0), (0, image_size - cov), (0, image_size - cov)))

    cy = np.zeros((image_size,), np.float32)
    for p in range(ppr):
        cy[p * S:p * S + K] += 1.0
    with np.errstate(divide="ignore"):
        inv_cnt = (1.0 / (cy[:, None] * cy[None, :])).astype(np.float32)
    return acc * jnp.asarray(inv_cnt)[None]


def prepare_params(params, kernel_size):
    """One-time packing of the 6 weight/bias tensors into one VMEM-resident block."""
    w1, b1, w2, b2, w3, b3 = [jnp.asarray(a, jnp.float32) for a in params]
    d = kernel_size * kernel_size
    rows = 16 + _round_up(d, 8)
    cols = max(d, 4) + 1
    bc = cols - 1
    p = jnp.zeros((rows, cols), jnp.float32)
    p = p.at[0:4, 0:d].set(w1.T)
    p = p.at[0:4, bc].set(b1)
    p = p.at[8:12, 0:4].set(w2.T)
    p = p.at[8:12, bc].set(b2)
    p = p.at[16:16 + d, 0:4].set(w3.T)
    p = p.at[16:16 + d, bc].set(b3)
    return p


@partial(jax.jit, static_argnames=("image_size", "kernel_size", "stride"))
def classical_autoencoder_forward(img, packed_params, *, image_size,
                                  kernel_size, stride):
    patches_t, ppr = extract_patches_t(img, kernel_size, stride)
    sims = mlp_cosine_pallas(patches_t, packed_params)
    return fold_average(sims, img.shape[0], image_size, kernel_size, stride, ppr)


# ----------------------------------------------------------------------------
# Pure-JAX reference mirroring the PyTorch math (independent gather/scatter
# path, sqrt + divide with eps=1e-8).
# ----------------------------------------------------------------------------
def _reference_forward(img, params, image_size, K, S):
    w1, b1, w2, b2, w3, b3 = [jnp.asarray(a, jnp.float32) for a in params]
    bs, _, h, _ = img.shape
    ppr = (h - K) // S + 1
    idx = (jnp.arange(ppr) * S)[:, None] + jnp.arange(K)[None, :]    # (ppr, K)
    img0 = img[:, 0]
    patches = img0[:, idx[:, None, :, None], idx[None, :, None, :]]  # (bs,ppr,ppr,K,K)
    patches = patches.reshape(bs * ppr * ppr, K * K).astype(jnp.float32)

    hdn = jax.nn.relu(patches @ w1 + b1)
    hdn = jax.nn.relu(hdn @ w2 + b2)
    y = jax.nn.relu(hdn @ w3 + b3)
    dot = jnp.sum(patches * y, axis=-1)
    denom = jnp.maximum(
        jnp.linalg.norm(patches, axis=-1) * jnp.linalg.norm(y, axis=-1), 1e-8)
    sims = (dot / denom).reshape(bs, ppr, ppr)

    ri = idx[:, None, :, None]
    ci = idx[None, :, None, :]
    upd = jnp.broadcast_to(sims[:, :, :, None, None], (bs, ppr, ppr, K, K))
    acc = jnp.zeros((bs, image_size, image_size), jnp.float32).at[:, ri, ci].add(upd)
    cnt = jnp.zeros((bs, image_size, image_size), jnp.float32).at[:, ri, ci].add(
        jnp.ones_like(upd))
    return acc / cnt


def init_params(key, kernel_size):
    """Deterministic init matching torch.nn.Linear shapes (stored as (in, out))."""
    d = kernel_size * kernel_size
    ks = jax.random.split(key, 6)

    def lin(kw, kb, fan_in, fan_out):
        bound = 1.0 / (fan_in ** 0.5)
        w = jax.random.uniform(kw, (fan_in, fan_out), jnp.float32, -bound, bound)
        b = jax.random.uniform(kb, (fan_out,), jnp.float32, -bound, bound)
        return w, b

    w1, b1 = lin(ks[0], ks[1], d, 4)
    w2, b2 = lin(ks[2], ks[3], 4, 4)
    w3, b3 = lin(ks[4], ks[5], 4, d)
    return (w1, b1, w2, b2, w3, b3)


if __name__ == "__main__":
    kernel_size = 4
    stride = 2
    bs, ch = 2, 1

    key = jax.random.PRNGKey(0)
    k_img, k_par, k_img2 = jax.random.split(key, 3)
    params = init_params(k_par, kernel_size)
    packed = prepare_params(params, kernel_size)

    # Case 1: small image (single grid step, partial last-lane tile masked in-kernel).
    image_size = 16
    img = jax.random.normal(k_img, (bs, ch, image_size, image_size), jnp.float32)
    out = classical_autoencoder_forward(
        img, packed, image_size=image_size, kernel_size=kernel_size, stride=stride)
    out = jax.block_until_ready(out)
    ref = jax.block_until_ready(
        _reference_forward(img, params, image_size, kernel_size, stride))
    assert out.shape == (bs, image_size, image_size)
    assert jnp.allclose(out, ref, atol=1e-4, rtol=1e-4), "mismatch vs reference (16x16)"

    # Case 2: larger image -> multi-tile "parallel" grid (>=2 steps for megacore).
    image_size2 = 64
    img2 = jax.random.normal(k_img2, (bs, ch, image_size2, image_size2), jnp.float32)
    out2 = classical_autoencoder_forward(
        img2, packed, image_size=image_size2, kernel_size=kernel_size, stride=stride)
    out2 = jax.block_until_ready(out2)
    ref2 = jax.block_until_ready(
        _reference_forward(img2, params, image_size2, kernel_size, stride))
    assert out2.shape == (bs, image_size2, image_size2)
    assert jnp.allclose(out2, ref2, atol=1e-4, rtol=1e-4), "mismatch vs reference (64x64)"

    print("KERNEL_OK")
</pallas_src>

<mosaic_0001>
module attributes {stable_mosaic.version = 11 : i64} {
  func.func @_mlp_cosine_kernel(%arg0: i32, %arg1: memref<16x128xf32, #tpu.memory_space<vmem>>, %arg2: memref<32x17xf32, #tpu.memory_space<vmem>>, %arg3: memref<1x128xf32, #tpu.memory_space<vmem>>) attributes {dimension_semantics = [#tpu.dimension_semantics<parallel>], iteration_bounds = array<i64: 1>, scalar_prefetch = 0 : i64, scratch_operands = 0 : i64, tpu.core_type = #tpu.core_type<tc>, window_params = [{transform_indices = @transform_0, window_bounds = array<i64: 16, 128>}, {pipeline_mode = #tpu.pipeline_mode<synchronous>, transform_indices = @transform_1, window_bounds = array<i64: 32, 17>}, {transform_indices = @transform_2, window_bounds = array<i64: 1, 128>}]} {
    %c0 = arith.constant 0 : index
    %c0_0 = arith.constant 0 : index
    %0 = vector.load %arg1[%c0, %c0_0] : memref<16x128xf32, #tpu.memory_space<vmem>>, vector<16x128xf32>
    %c0_1 = arith.constant 0 : index
    %c0_2 = arith.constant 0 : index
    %1 = vector.load %arg2[%c0_1, %c0_2] : memref<32x17xf32, #tpu.memory_space<vmem>>, vector<4x16xf32>
    %c0_3 = arith.constant 0 : index
    %c16 = arith.constant 16 : index
    %2 = vector.load %arg2[%c0_3, %c16] : memref<32x17xf32, #tpu.memory_space<vmem>>, vector<4x1xf32>
    %c8 = arith.constant 8 : index
    %c0_4 = arith.constant 0 : index
    %3 = vector.load %arg2[%c8, %c0_4] : memref<32x17xf32, #tpu.memory_space<vmem>>, vector<4x4xf32>
    %c8_5 = arith.constant 8 : index
    %c16_6 = arith.constant 16 : index
    %4 = vector.load %arg2[%c8_5, %c16_6] : memref<32x17xf32, #tpu.memory_space<vmem>>, vector<4x1xf32>
    %c16_7 = arith.constant 16 : index
    %c0_8 = arith.constant 0 : index
    %5 = vector.load %arg2[%c16_7, %c0_8] : memref<32x17xf32, #tpu.memory_space<vmem>>, vector<16x4xf32>
    %c16_9 = arith.constant 16 : index
    %c16_10 = arith.constant 16 : index
    %6 = vector.load %arg2[%c16_9, %c16_10] : memref<32x17xf32, #tpu.memory_space<vmem>>, vector<16x1xf32>
    %cst = arith.constant dense<0.000000e+00> : vector<4x128xf32>
    %7 = tpu.matmul %1, %0, %cst {dimension_numbers = #tpu.dot_dimension_numbers<[1], [0], [0], [1], [0, 0, 1, 1], [], []>} : vector<4x16xf32>, vector<16x128xf32>, vector<4x128xf32> -> vector<4x128xf32>
    %8 = vector.broadcast %2 : vector<4x1xf32> to vector<4x128xf32>
    %9 = arith.addf %7, %8 : vector<4x128xf32>
    %cst_11 = arith.constant 0.000000e+00 : f32
    %10 = vector.broadcast %cst_11 : f32 to vector<4x128xf32>
    %11 = arith.maximumf %9, %10 : vector<4x128xf32>
    %cst_12 = arith.constant dense<0.000000e+00> : vector<4x128xf32>
    %12 = tpu.matmul %3, %11, %cst_12 {dimension_numbers = #tpu.dot_dimension_numbers<[1], [0], [0], [1], [0, 0, 1, 1], [], []>} : vector<4x4xf32>, vector<4x128xf32>, vector<4x128xf32> -> vector<4x128xf32>
    %13 = vector.broadcast %4 : vector<4x1xf32> to vector<4x128xf32>
    %14 = arith.addf %12, %13 : vector<4x128xf32>
    %cst_13 = arith.constant 0.000000e+00 : f32
    %15 = vector.broadcast %cst_13 : f32 to vector<4x128xf32>
    %16 = arith.maximumf %14, %15 : vector<4x128xf32>
    %cst_14 = arith.constant dense<0.000000e+00> : vector<16x128xf32>
    %17 = tpu.matmul %5, %16, %cst_14 {dimension_numbers = #tpu.dot_dimension_numbers<[1], [0], [0], [1], [0, 0, 1, 1], [], []>} : vector<16x4xf32>, vector<4x128xf32>, vector<16x128xf32> -> vector<16x128xf32>
    %18 = vector.broadcast %6 : vector<16x1xf32> to vector<16x128xf32>
    %19 = arith.addf %17, %18 : vector<16x128xf32>
    %cst_15 = arith.constant 0.000000e+00 : f32
    %20 = vector.broadcast %cst_15 : f32 to vector<16x128xf32>
    %21 = arith.maximumf %19, %20 : vector<16x128xf32>
    %22 = arith.mulf %0, %21 : vector<16x128xf32>
    %cst_16 = arith.constant dense<0.000000e+00> : vector<128xf32>
    %23 = vector.multi_reduction <add>, %22, %cst_16 [0] : vector<16x128xf32> to vector<128xf32>
    %24 = vector.shape_cast %23 : vector<128xf32> to vector<1x128xf32>
    %25 = arith.mulf %0, %0 : vector<16x128xf32>
    %cst_17 = arith.constant dense<0.000000e+00> : vector<128xf32>
    %26 = vector.multi_reduction <add>, %25, %cst_17 [0] : vector<16x128xf32> to vector<128xf32>
    %27 = vector.shape_cast %26 : vector<128xf32> to vector<1x128xf32>
    %28 = arith.mulf %21, %21 : vector<16x128xf32>
    %cst_18 = arith.constant dense<0.000000e+00> : vector<128xf32>
    %29 = vector.multi_reduction <add>, %28, %cst_18 [0] : vector<16x128xf32> to vector<128xf32>
    %30 = vector.shape_cast %29 : vector<128xf32> to vector<1x128xf32>
    %31 = arith.mulf %27, %30 : vector<1x128xf32>
    %cst_19 = arith.constant 1.000000e-16 : f32
    %32 = vector.broadcast %cst_19 : f32 to vector<1x128xf32>
    %33 = arith.maximumf %31, %32 : vector<1x128xf32>
    %34 = math.rsqrt %33 : vector<1x128xf32>
    %35 = arith.mulf %24, %34 : vector<1x128xf32>
    %c128_i32 = arith.constant 128 : i32
    %36 = arith.muli %arg0, %c128_i32 : i32
    %37 = tpu.iota {dimensions = array<i32: 1>} : vector<1x128xi32>
    %38 = vector.broadcast %36 : i32 to vector<1x128xi32>
    %39 = arith.addi %38, %37 : vector<1x128xi32>
    %c98_i32 = arith.constant 98 : i32
    %40 = vector.broadcast %c98_i32 : i32 to vector<1x128xi32>
    %41 = arith.cmpi slt, %39, %40 : vector<1x128xi32>
    %cst_20 = arith.constant 0.000000e+00 : f32
    %42 = vector.broadcast %cst_20 : f32 to vector<1x128xf32>
    %43 = arith.select %41, %35, %42 : vector<1x128xi1>, vector<1x128xf32>
    %c0_21 = arith.constant 0 : index
    %c0_22 = arith.constant 0 : index
    %44 = vector.load %arg3[%c0_21, %c0_22] : memref<1x128xf32, #tpu.memory_space<vmem>>, vector<1x128xf32>
    tpu.vector_store %arg3[%c0_21, %c0_22], %43 {strides = array<i32>} : memref<1x128xf32, #tpu.memory_space<vmem>>, vector<1x128xf32>,
    return
  }
  func.func @transform_0(%arg0: i32) -> (i32, i32) {
    %c0_i32 = arith.constant 0 : i32
    %c0_i32_0 = arith.constant 0 : i32
    return %c0_i32, %arg0 : i32, i32
  }
  func.func @transform_1(%arg0: i32) -> (i32, i32) {
    %c0_i32 = arith.constant 0 : i32
    %c0_i32_0 = arith.constant 0 : i32
    %c0_i32_1 = arith.constant 0 : i32
    return %c0_i32, %c0_i32_0 : i32, i32
  }
  func.func @transform_2(%arg0: i32) -> (i32, i32) {
    %c0_i32 = arith.constant 0 : i32
    %c0_i32_0 = arith.constant 0 : i32
    return %c0_i32, %arg0 : i32, i32
  }
}

</mosaic_0001>

<bundles_post_ra>
// kernel: squeeze.4
= control target key start
LH: loop header
LB: loop body
LE: loop exit
PB: predicated region body
PF: predicated region fallthrough
CT: control target
= control target key end

     0   :  { %s115_s8 = smov 107   ;;  %vm8_vm0 = vcmask 56320   ;;  %s116_s9 = smov 114   ;;  %s196_s0 = inlined_call_operand.vmem [shape: f32[98], index: 0, kind: input, shape index: {}]   ;;  %s197_s1 = inlined_call_operand.vmem [shape: f32[2,1,7,7], index: 1, kind: output, shape index: {}]  }
   0x1   :  { %v5_v0 = vld [vmem:[%s196_s0] sm:$0x1]  ;;  %s114_s0 = smov 121   ;;  %s117_s10 = smov 100  }
   0x2   :  { %6 = vst [vmem:[#allocation0] sm:$0x1] %v5_v0  ;;  %s118_s13 = smov 93   ;;  %s119_s14 = smov 86  }
   0x3   :  { %s120_s15 = smov 79   ;;  %s121_s16 = smov 72  }
   0x4   :  { %s122_s17 = smov 65   ;;  %s123_s18 = smov 58  }
   0x5   :  { %s124_s19 = smov 51   ;;  %s125_s20 = smov 44  }
   0x6   :  { %s126_s21 = smov 37  }
   0x9   :  { %v10_v1 = vld [vmem:[#allocation0] sm:$0x1]  }
   0xa   :  { %v22_v2 = vld [vmem:[#allocation0] sm:$0x1]   ;;  %11 = vrot.lane.b32.xlu0 %v10_v1, %s114_s0 }
   0xb   :  { %23 = vrot.lane.b32.xlu1 %v22_v2, %s115_s8  ;;  %v16_v3 = vld [vmem:[#allocation0] sm:$0x1]  }
   0xc   :  { %v28_v4 = vld [vmem:[#allocation0] sm:$0x1]  }
   0xd   :  { %v7_v5 = vld [vmem:[#allocation0] sm:$0x1]  }
   0xe   :  { %17 = vrot.lane.b32.xlu0 %v16_v3, %s116_s9  ;;  %9 = vst.msk [vmem:[%s197_s1] sm:$0x1] %vm8_vm0, %v7_v5   ;;  %v34_v6 = vld [vmem:[#allocation0] sm:$0x1]  }
   0xf   :  { %29 = vrot.lane.b32.xlu1 %v28_v4, %s117_s10  ;;  %v40_v7 = vld [vmem:[#allocation0] sm:$0x1]  }
  0x10   :  { %v46_v8 = vld [vmem:[#allocation0] sm:$0x1]  }
  0x11   :  { %v52_v9 = vld [vmem:[#allocation0] sm:$0x1]  }
  0x12   :  { %35 = vrot.lane.b32.xlu0 %v34_v6, %s118_s13  ;;  %v58_v10 = vld [vmem:[#allocation0] sm:$0x1]  }
  0x13   :  { %41 = vrot.lane.b32.xlu1 %v40_v7, %s119_s14  ;;  %v64_v11 = vld [vmem:[#allocation0] sm:$0x1]  }
  0x14   :  { %v70_v12 = vld [vmem:[#allocation0] sm:$0x1]  }
  0x15   :  { %v76_v13 = vld [vmem:[#allocation0] sm:$0x1]  }
  0x16   :  { %47 = vrot.lane.b32.xlu0 %v46_v8, %s120_s15  ;;  %v82_v14 = vld [vmem:[#allocation0] sm:$0x1]  }
  0x17   :  { %53 = vrot.lane.b32.xlu1 %v52_v9, %s121_s16 }
  0x1a   :  { %59 = vrot.lane.b32.xlu0 %v58_v10, %s122_s17 }
  0x1b   :  { %65 = vrot.lane.b32.xlu1 %v64_v11, %s123_s18 }
  0x1e   :  { %71 = vrot.lane.b32.xlu0 %v70_v12, %s124_s19 }
  0x1f   :  { %77 = vrot.lane.b32.xlu1 %v76_v13, %s125_s20 }
  0x22   :  { %83 = vrot.lane.b32.xlu0 %v82_v14, %s126_s21 }
  0x7c   :  { %v12_v15 = vpop.permute.xlu0 %11  }
  0x7d   :  { %v24_v16 = vpop.permute.xlu1 %23   ;;  %88 = vst.msk [vmem:[%s197_s1 + $0x1] sm:$0x1] %vm8_vm0, %v12_v15  }
  0x7e   :  { %90 = vst.msk [vmem:[%s197_s1 + $0x3] sm:$0x1] %vm8_vm0, %v24_v16  }
  0x80   :  { %v18_v17 = vpop.permute.xlu0 %17  }
  0x81   :  { %v30_v18 = vpop.permute.xlu1 %29   ;;  %89 = vst.msk [vmem:[%s197_s1 + $0x2] sm:$0x1] %vm8_vm0, %v18_v17  }
  0x82   :  { %91 = vst.msk [vmem:[%s197_s1 + $0x4] sm:$0x1] %vm8_vm0, %v30_v18  }
  0x84   :  { %v36_v19 = vpop.permute.xlu0 %35  }
  0x85   :  { %v42_v20 = vpop.permute.xlu1 %41   ;;  %92 = vst.msk [vmem:[%s197_s1 + $0x5] sm:$0x1] %vm8_vm0, %v36_v19  }
  0x86   :  { %93 = vst.msk [vmem:[%s197_s1 + $0x6] sm:$0x1] %vm8_vm0, %v42_v20  }
  0x88   :  { %v48_v21 = vpop.permute.xlu0 %47  }
  0x89   :  { %v54_v22 = vpop.permute.xlu1 %53   ;;  %94 = vst.msk [vmem:[%s197_s1 + $0x8] sm:$0x1] %vm8_vm0, %v48_v21  }
  0x8a   :  { %95 = vst.msk [vmem:[%s197_s1 + $0x9] sm:$0x1] %vm8_vm0, %v54_v22  }
  0x8c   :  { %v60_v23 = vpop.permute.xlu0 %59  }
  0x8d   :  { %v66_v24 = vpop.permute.xlu1 %65   ;;  %96 = vst.msk [vmem:[%s197_s1 + $0xa] sm:$0x1] %vm8_vm0, %v60_v23  }
  0x8e   :  { %97 = vst.msk [vmem:[%s197_s1 + $0xb] sm:$0x1] %vm8_vm0, %v66_v24  }
  0x90   :  { %v72_v25 = vpop.permute.xlu0 %71  }
  0x91   :  { %v78_v26 = vpop.permute.xlu1 %77   ;;  %98 = vst.msk [vmem:[%s197_s1 + $0xc] sm:$0x1] %vm8_vm0, %v72_v25  }
  0x92   :  { %99 = vst.msk [vmem:[%s197_s1 + $0xd] sm:$0x1] %vm8_vm0, %v78_v26  }
  0x94   :  { %v84_v27 = vpop.permute.xlu0 %83  }
  0x95   :  { %100 = vst.msk [vmem:[%s197_s1 + $0xe] sm:$0x1] %vm8_vm0, %v84_v27  }

// kernel: classical_autoencoder_forward.1
= control target key start
LH: loop header
LB: loop body
LE: loop exit
PB: predicated region body
PF: predicated region fallthrough
CT: control target
= control target key end

     0   :  { %v354_v0 = vmov 0.0   ;;  %vm355_vm0 = vmmov 0   ;;  %vm22_vm1 = vcmask 130048   ;;  %v356_v4 = vmov 16   ;;  %s396_s0 = inlined_call_operand.vmem [shape: f32[16,98], index: 0, kind: input, shape index: {}]   ;;  %s397_s1 = inlined_call_operand.vmem [shape: f32[32,17], index: 1, kind: input, shape index: {}]   ;;  %s398_s2 = inlined_call_operand.vmem [shape: f32[1,128], index: 2, kind: output, shape index: {}]  }
   0x1   :  { %330 = vmatprep.subr.mxu0 %v354_v0  ;;  %v12_v1 = vld [vmem:[%s396_s0 + $0x8] sm:$0xff]  ;;  %v11_v2 = vld [vmem:[%s396_s0] sm:$0xff]  ;;  %334 = vmatprep.mubr.msk.f32.mxu0 %vm355_vm0, %v354_v0  ;;  %vm104_vm2 = vcmask 1043456   ;;  %vm101_vm3 = vcmask 31744   ;;  %v15_v11 = vld [vmem:[%s397_s1 + $0x10] sm:$0xff]  ;;  %v305_v53 = vlaneseq }
   0x2   :  { %331 = vmatpush3.msra.mxu0 %v12_v1  ;;  %v13_v3 = vld [vmem:[%s397_s1] sm:$0xf]  ;;  %350 = vset.pattern.permute.xlu0 %v356_v4  ;;  %v14_v5 = vld [vmem:[%s397_s1 + $0x8] sm:$0xf]  ;;  %v16_v12 = vld [vmem:[%s397_s1 + $0x18] sm:$0xff]  ;;  %v283_v18 = vmul.f32 %v12_v1, %v12_v1  ;;  %v282_v19 = vmul.f32 %v11_v2, %v11_v2 }
   0x3   :  { %332 = vmatprep.subr.mxu0 %v354_v0  ;;  %19 = vperm.xlu0 %350, %v13_v3   ;;  %v306_v55 = vand.u32 127, %v305_v53 }
   0x4   :  { %333 = vmatpush3.msra.mxu0 %v11_v2  ;;  %337 = vmatprep.subr.mxu1 %v354_v0  ;;  %v284_v21 = vadd.f32 %v283_v18, %v282_v19 }
   0x5   :  { %335 = vmatmul.mubr.msk.f32.vlgmr.msra.gmra.mxu0 %vm22_vm1, %v13_v3  ;;  %339 = vmatprep.mubr.msk.f32.mxu1 %vm355_vm0, %v354_v0  ;;  %vm309_vm4 = vcmp.lt.s32.totalorder %v306_v55, 98 }
   0x6   :  { %351 = vset.pattern.permute.xlu1 %v356_v4  ;;  %v285_v22 = vrot.slane %v284_v21, 4 }
   0x7   :  { %98 = vperm.xlu0 %350, %v14_v5   ;;  %181 = vperm.xlu1 %351, %v15_v11  }
   0x8   :  { %v286_v27 = vadd.f32 %v285_v22, %v284_v21 }
   0xa   :  { %v287_v31 = vrot.slane %v286_v27, 2 }
   0xb   :  { %186 = vperm.xlu1 %351, %v16_v12  }
   0xc   :  { %v288_v35 = vadd.f32 %v287_v31, %v286_v27 }
   0xe   :  { %v289_v40 = vrot.slane %v288_v35, 1 }
  0x10   :  { %v290_v44 = vadd.f32 %v289_v40, %v288_v35 }
  0x7e   :  { %v20_v6 = vpop.permute.xlu0 %19 }
  0x82   :  { %v99_v13 = vpop.permute.xlu0 %98  ;;  %v182_v20 = vpop.permute.xlu1 %181 }
  0x86   :  { %v187_v24 = vpop.permute.xlu1 %186 }
  0xc5   :  { %v91_v7 = vpop.f32.mrf.mxu0 }
  0xc6   :  { %v92_v8 = vadd.f32 %v91_v7, %v20_v6 }
  0xc7   :  { %v336_v9 = vpop.f32.mrf.mxu0 }
  0xc8   :  { %v95_v10 = vmax.f32 %v92_v8, 0.0 }
  0xca   :  { %338 = vmatpush3.msk.msra.mxu1 %vm104_vm2, %v95_v10 }
  0xcb   :  { %340 = vmatmul.mubr.msk.f32.vlgmr.msra.gmra.mxu1 %vm101_vm3, %v14_v5 }
  0xcc   :  { %344 = vmatprep.mubr.msk.f32.mxu1 %vm101_vm3, %v15_v11 }
 0x18b   :  { %v174_v14 = vpop.f32.mrf.mxu1 }
 0x18c   :  { %v175_v15 = vadd.f32 %v174_v14, %v99_v13 }
 0x18d   :  { %v341_v16 = vpop.f32.mrf.mxu1 }
 0x18e   :  { %v178_v17 = vmax.f32 %v175_v15, 0.0 }
 0x190   :  { %342 = vmatprep.subr.msk.mxu1 %vm104_vm2, %v178_v17 }
 0x191   :  { %343 = vmatpush3.msk.msra.mxu1 %vm104_vm2, %v178_v17 }
 0x192   :  { %345 = vmatmul.mubr.msk.f32.vlgmr.msra.gmra.mxu1 %vm101_vm3, %v16_v12 }
 0x252   :  { %v346_v23 = vpop.f32.mrf.mxu1 }
 0x253   :  { %v268_v25 = vadd.f32 %v346_v23, %v187_v24 }
 0x254   :  { %v262_v26 = vpop.f32.mrf.mxu1 }
 0x255   :  { %v272_v28 = vmax.f32 %v268_v25, 0.0  ;;  %v263_v29 = vadd.f32 %v262_v26, %v182_v20 }
 0x257   :  { %v271_v30 = vmax.f32 %v263_v29, 0.0  ;;  %v292_v32 = vmul.f32 %v272_v28, %v272_v28  ;;  %v274_v38 = vmul.f32 %v272_v28, %v12_v1 }
 0x259   :  { %v291_v33 = vmul.f32 %v271_v30, %v271_v30  ;;  %v273_v36 = vmul.f32 %v271_v30, %v11_v2 }
 0x25b   :  { %v293_v34 = vadd.f32 %v292_v32, %v291_v33  ;;  %v275_v41 = vadd.f32 %v274_v38, %v273_v36 }
 0x25d   :  { %v294_v37 = vrot.slane %v293_v34, 4  ;;  %v276_v45 = vrot.slane %v275_v41, 4 }
 0x25f   :  { %v295_v39 = vadd.f32 %v294_v37, %v293_v34  ;;  %v277_v48 = vadd.f32 %v276_v45, %v275_v41 }
 0x261   :  { %v296_v42 = vrot.slane %v295_v39, 2  ;;  %v278_v51 = vrot.slane %v277_v48, 2 }
 0x263   :  { %v297_v43 = vadd.f32 %v296_v42, %v295_v39  ;;  %v279_v52 = vadd.f32 %v278_v51, %v277_v48 }
 0x265   :  { %v298_v46 = vrot.slane %v297_v43, 1  ;;  %v280_v54 = vrot.slane %v279_v52, 1 }
 0x267   :  { %v299_v47 = vadd.f32 %v298_v46, %v297_v43  ;;  %v281_v56 = vadd.f32 %v280_v54, %v279_v52 }
 0x269   :  { %v300_v49 = vmul.f32 %v299_v47, %v290_v44 }
 0x26b   :  { %v301_v50 = vmax.f32 %v300_v49, 1e-16 }
 0x26d   :  { %352 = vrsqrt.f32 %v301_v50 }
 0x27a   :  { %v353_v57 = vpop.eup %352 }
 0x27b   :  { %v303_v58 = vmul.f32 %v353_v57, %v281_v56 }
 0x27d   :  { %v310_v59 = vsel %vm309_vm4, %v303_v58, 0.0 }
 0x27e   :  { %311 = vst [vmem:[%s398_s2] sm:$0x1] %v310_v59 }

</bundles_post_ra>
